<compile_context>
chip_gen: v6e
topology: v6e:2x2x1
jax: 0.10.0
libtpu: 0.0.40
codegen_flags: <defaults>
</compile_context>

<pallas_src>
import functools
import math

import jax
import jax.numpy as jnp
from jax.experimental import pallas as pl
from jax.experimental.pallas import tpu as pltpu


def _round_up(n, m):
    return (n + m - 1) // m * m


def _conv1d_mm_kernel(x_ref, w_ref, b_ref, o_ref):
    # x_ref: (C_in*K, Tw)   im2col patch tile for one batch element (W on lanes)
    # w_ref: (C_out, C_in*K) packed weight, resident across all grid steps
    # b_ref: (C_out, 1)      bias column, resident
    # o_ref: (C_out, Tw)     native-NCW output tile (lane-dense stores)
    acc = jnp.dot(w_ref[...], x_ref[...], preferred_element_type=jnp.float32)
    o_ref[...] = (acc + b_ref[...]).astype(o_ref.dtype)


def custom_conv1d(x, weight, bias, *, stride=1, padding=0, tile_w=512):
    """Matches CustomConv1d.forward: x (B, C_in, W) -> (B, C_out, W_out)."""
    B, C_in, W = x.shape
    C_out, C_in_w, K = weight.shape
    assert C_in == C_in_w
    W_out = (W + 2 * padding - K) // stride + 1
    assert W_out > 0, "invalid conv geometry"

    x_p = jnp.pad(x, ((0, 0), (0, 0), (padding, padding))) if padding > 0 else x

    # im2col (plain-JAX glue): patches[b, c*K + k, j] = x_p[b, c, j*stride + k]
    gather_idx = jnp.arange(K)[:, None] + jnp.arange(W_out)[None, :] * stride  # (K, W_out)
    cols = x_p[:, :, gather_idx]                 # (B, C_in, K, W_out)
    patches = cols.reshape(B, C_in * K, W_out)   # contraction on sublanes, W_out on lanes

    w_mat = weight.reshape(C_out, C_in * K)      # (C_out, C_in*K), matches (c, k) packing
    if bias is None:
        bias = jnp.zeros((C_out,), x.dtype)
    b_col = bias.reshape(C_out, 1).astype(x.dtype)

    # Lane-dense width tiling: tile is a multiple of 128, capped at tile_w.
    tw = min(_round_up(tile_w, 128), _round_up(W_out, 128))
    W_out_pad = _round_up(W_out, tw)
    if W_out_pad != W_out:
        patches = jnp.pad(patches, ((0, 0), (0, 0), (0, W_out_pad - W_out)))
    n_w = W_out_pad // tw
    CK = C_in * K

    out = pl.pallas_call(
        _conv1d_mm_kernel,
        out_shape=jax.ShapeDtypeStruct((B, C_out, W_out_pad), x.dtype),
        grid=(B, n_w),
        in_specs=[
            pl.BlockSpec((None, CK, tw), lambda b, w: (b, 0, w)),   # patch tile
            pl.BlockSpec((C_out, CK), lambda b, w: (0, 0)),         # weight (resident)
            pl.BlockSpec((C_out, 1), lambda b, w: (0, 0)),          # bias (resident)
        ],
        out_specs=pl.BlockSpec((None, C_out, tw), lambda b, w: (b, 0, w)),
        compiler_params=pltpu.CompilerParams(
            dimension_semantics=("parallel", "parallel")
        ),
    )(patches, w_mat, b_col)

    if W_out_pad != W_out:
        out = out[:, :, :W_out]
    return out  # (B, C_out, W_out), already NCW


if __name__ == "__main__":
    # Small shapes consistent with a Conv1d forward.
    B, C_in, W = 2, 4, 16
    C_out, K, stride, padding = 8, 3, 2, 1

    key = jax.random.PRNGKey(0)
    kw, kx = jax.random.split(key)

    # Deterministic init matching reset_parameters():
    #   kaiming_uniform_(a=sqrt(5)) -> U(-1/sqrt(fan_in), 1/sqrt(fan_in)); bias zeros.
    fan_in = C_in * K
    bound = 1.0 / math.sqrt(fan_in)
    weight = jax.random.uniform(kw, (C_out, C_in, K), jnp.float32, -bound, bound)
    bias = jnp.zeros((C_out,), jnp.float32)

    x = jax.random.normal(kx, (B, C_in, W), jnp.float32)

    conv = jax.jit(functools.partial(custom_conv1d, stride=stride, padding=padding))
    out = jax.block_until_ready(conv(x, weight, bias))

    # Pure-JAX reference reproducing the PyTorch loop semantics.
    x_p = jnp.pad(x, ((0, 0), (0, 0), (padding, padding)))
    W_out = (W + 2 * padding - K) // stride + 1
    cols = jnp.stack(
        [x_p[:, :, j * stride : j * stride + K] for j in range(W_out)], axis=-1
    )  # (B, C_in, K, W_out)
    ref = jnp.einsum("bckw,ock->bow", cols, weight) + bias[None, :, None]

    assert out.shape == (B, C_out, W_out), out.shape
    assert jnp.allclose(out, ref, atol=1e-5, rtol=1e-5), float(
        jnp.max(jnp.abs(out - ref))
    )
    print("KERNEL_OK")
</pallas_src>

<mosaic_0001>
module attributes {stable_mosaic.version = 11 : i64} {
  func.func @_conv1d_mm_kernel(%arg0: i32, %arg1: i32, %arg2: memref<1x12x128xf32, #tpu.memory_space<vmem>>, %arg3: memref<8x12xf32, #tpu.memory_space<vmem>>, %arg4: memref<8x1xf32, #tpu.memory_space<vmem>>, %arg5: memref<1x8x128xf32, #tpu.memory_space<vmem>>) attributes {dimension_semantics = [#tpu.dimension_semantics<parallel>, #tpu.dimension_semantics<parallel>], iteration_bounds = array<i64: 2, 1>, scalar_prefetch = 0 : i64, scratch_operands = 0 : i64, tpu.core_type = #tpu.core_type<tc>, window_params = [{transform_indices = @transform_0, window_bounds = array<i64: 1, 12, 128>}, {pipeline_mode = #tpu.pipeline_mode<synchronous>, transform_indices = @transform_1, window_bounds = array<i64: 8, 12>}, {pipeline_mode = #tpu.pipeline_mode<synchronous>, transform_indices = @transform_2, window_bounds = array<i64: 8, 1>}, {transform_indices = @transform_3, window_bounds = array<i64: 1, 8, 128>}]} {
    %c0 = arith.constant 0 : index
    %c0_0 = arith.constant 0 : index
    %0 = vector.load %arg3[%c0, %c0_0] : memref<8x12xf32, #tpu.memory_space<vmem>>, vector<8x12xf32>
    %c0_1 = arith.constant 0 : index
    %c0_2 = arith.constant 0 : index
    %c0_3 = arith.constant 0 : index
    %1 = vector.load %arg2[%c0_1, %c0_2, %c0_3] : memref<1x12x128xf32, #tpu.memory_space<vmem>>, vector<1x12x128xf32>
    %2 = vector.shape_cast %1 : vector<1x12x128xf32> to vector<12x128xf32>
    %cst = arith.constant dense<0.000000e+00> : vector<8x128xf32>
    %3 = tpu.matmul %0, %2, %cst {dimension_numbers = #tpu.dot_dimension_numbers<[1], [0], [0], [1], [0, 0, 1, 1], [], []>} : vector<8x12xf32>, vector<12x128xf32>, vector<8x128xf32> -> vector<8x128xf32>
    %c0_4 = arith.constant 0 : index
    %c0_5 = arith.constant 0 : index
    %4 = vector.load %arg4[%c0_4, %c0_5] : memref<8x1xf32, #tpu.memory_space<vmem>>, vector<8x1xf32>
    %5 = vector.broadcast %4 : vector<8x1xf32> to vector<8x128xf32>
    %6 = arith.addf %3, %5 : vector<8x128xf32>
    %c0_6 = arith.constant 0 : index
    %c0_7 = arith.constant 0 : index
    %c0_8 = arith.constant 0 : index
    %7 = vector.load %arg5[%c0_6, %c0_7, %c0_8] : memref<1x8x128xf32, #tpu.memory_space<vmem>>, vector<1x8x128xf32>
    %8 = vector.shape_cast %7 : vector<1x8x128xf32> to vector<8x128xf32>
    %9 = vector.shape_cast %6 : vector<8x128xf32> to vector<1x8x128xf32>
    tpu.vector_store %arg5[%c0_6, %c0_7, %c0_8], %9 {strides = array<i32>} : memref<1x8x128xf32, #tpu.memory_space<vmem>>, vector<1x8x128xf32>,
    return
  }
  func.func @transform_0(%arg0: i32, %arg1: i32) -> (i32, i32, i32) {
    %c0_i32 = arith.constant 0 : i32
    %c0_i32_0 = arith.constant 0 : i32
    return %arg0, %c0_i32, %arg1 : i32, i32, i32
  }
  func.func @transform_1(%arg0: i32, %arg1: i32) -> (i32, i32) {
    %c0_i32 = arith.constant 0 : i32
    %c0_i32_0 = arith.constant 0 : i32
    %c0_i32_1 = arith.constant 0 : i32
    return %c0_i32, %c0_i32_0 : i32, i32
  }
  func.func @transform_2(%arg0: i32, %arg1: i32) -> (i32, i32) {
    %c0_i32 = arith.constant 0 : i32
    %c0_i32_0 = arith.constant 0 : i32
    %c0_i32_1 = arith.constant 0 : i32
    return %c0_i32, %c0_i32_0 : i32, i32
  }
  func.func @transform_3(%arg0: i32, %arg1: i32) -> (i32, i32, i32) {
    %c0_i32 = arith.constant 0 : i32
    %c0_i32_0 = arith.constant 0 : i32
    return %arg0, %c0_i32, %arg1 : i32, i32, i32
  }
}

</mosaic_0001>

<bundles_post_ra>
// kernel: custom_conv1d.1
= control target key start
LH: loop header
LB: loop body
LE: loop exit
PB: predicated region body
PF: predicated region fallthrough
CT: control target
= control target key end

     0   :  { %8 = vsyncpa [#allocation3], 0  ;;  %s668_s0 = inlined_call_operand.vmem [shape: f32[2,12,128], index: 0, kind: input, shape index: {}]   ;;  %s669_s1 = inlined_call_operand.vmem [shape: f32[8,12], index: 1, kind: input, shape index: {}]   ;;  %s670_s2 = inlined_call_operand.vmem [shape: f32[8,1], index: 2, kind: input, shape index: {}]   ;;  %s671_s3 = inlined_call_operand.hbm [shape: f32[2,8,128], index: 3, kind: output, shape index: {}]  }
   0x1   :  { %10 = vsyncpa [#allocation3 + $0x1], 0  ;;  %s557_s12 = smov 0   ;;  %s559_s13 = smov 0  }
   0x2   :  { %s561_s14 = smov 0   ;;  %s563_s15 = smov 0  }
   0x3   :  { %s565_s16 = smov 0   ;;  %s567_s17 = smov 0  }
   0x4 LB: > { %s371_s18 = sadd.s32 4294967295, %s531_s17   ;;  %s372_s19 = sadd.s32 4294967294, %s531_s17   ;;  %s531_s17 = sphi %s567_s17, %s16_s17   ;;  %s527_s16 = sphi %s565_s16, %s678_s16   ;;  %s523_s15 = sphi %s563_s15, %s677_s15   ;;  %s519_s14 = sphi %s561_s14, %s676_s14   ;;  %s515_s13 = sphi %s559_s13, %s675_s13   ;;  %s511_s12 = sphi %s557_s12, %s674_s12  }
   0x5   : > { %s28_s20 = sadd.s32 1, %s527_s16  ;;  %s107_s21 = sadd.s32 1, %s519_s14 }
   0x6   : > { %p30_p0 = scmp.ge.s32.totalorder %s28_s20, 2  ;;  %p117_p1 = scmp.ne.s32.totalorder %s519_s14, %s515_s13 }
   0x7   : > { %p118_p2 = scmp.eq.s32.totalorder %s371_s18, 1  ;;  %p123_p3 = scmp.ne.s32.totalorder %s515_s13, %s511_s12 }
   0x8   : > { %s680_s20 = smov (%p30_p0, %s28_s20), 0  ;;  %p124_p5 = scmp.eq.s32.totalorder %s372_s19, 1 }
   0x9   : > { %p597_p4 = por %p118_p2, %p117_p1  ;;  %s102_s23 = ssub.s32 %s527_s16, %s680_s20 }
   0xa   : > { %p375_p6 = scmp.ge.s32.totalorder %s531_s17, 1  ;;  %p105_p7 = scmp.eq.s32.totalorder %s102_s23, 0 }
   0xb   : > { %p604_p8 = por %p124_p5, %p123_p3  ;;  %p159_p9 = scmp.lt.s32.totalorder %s531_s17, 3 }
   0xc   : > { %s610_s25 = scalar_select %p105_p7, %s519_s14, %s107_s21  }
   0xd   : > { %p160_p10 = pnand %p375_p6, %p159_p9 }
   0xe   : > { %p186_p11 = scmp.lt.s32.totalorder (!%p160_p10), %s523_s15, 1  ;;  %s183_s8 = sand.u32 (!%p160_p10), 1, %s515_s13  }
   0xf   : > { %163 = sbr.rel (%p160_p10) target bundleno = 236 (0xec), region = 32  ;;  %s376_s9 = sshll.u32 (!%p160_p10), %s183_s8, 3 }
  0x10   : > { %s382_s10 = sshll.u32 (!%p160_p10), %s523_s15, 7  ;;  %s185_s11 = scalar_lea.vmem (!%p160_p10), [#allocation2], %s376_s9 }
  0x11   : > { %s297_s18 = sshll.u32 (!%p160_p10), %s185_s11, 4  ;;  %s628_s23 = scalar_lea.hbm (!%p160_p10), %s671_s3, %s382_s10  ;;  %s298_s18 = int_to_ptr.vmem [resolvable:$true] %s297_s18 }
  0x12   : > { %s283_s26 = scalar_lea.sflag (!%p160_p10), [#allocation3], %s183_s8  ;;  %s455_s27 = scalar_lea.vmem (!%p160_p10), %s298_s18, 128 }
  0x13   : > { %p456_p12 = scmp.ne.s32.totalorder (!%p160_p10), %s298_s18, %s455_s27 }
  0x14   : > { %v533_v0 = vmov 0.0   ;;  %vm534_vm0 = vmmov 0   ;;  %v197_v1 = vld [vmem:[%s670_s2] sm:$0xff]  ;;  %s187_s28 = scalar_select %p186_p11, %s523_s15, 1  ;;  %v535_v2 = vmov 0   ;;  %vm207_vm1 = vcmask 1043456  }
  0x15   : > { %389 = vmatprep.subr.mxu0 %v533_v0  ;;  %393 = vmatprep.mubr.msk.f32.mxu0 %vm534_vm0, %v533_v0  ;;  %v194_v5 = vld [vmem:[%s669_s1] sm:$0xff]  ;;  %vm203_vm2 = vcmask 97280   ;;  %p457_p13 = pnand %p456_p12, %p597_p4 }
  0x16   : > { %454 = vset.pattern.permute.xlu0 %v535_v2  ;;  %s385_s29 = sshll.u32 %s187_s28, 4  ;;  %s536_s28 = smov [#allocation2]  }
  0x17   : > { %200 = vperm.xlu0 %454, %v197_v1   ;;  %s193_s5 = scalar_lea.vmem %s668_s0, %s385_s29  ;;  %p458_p0 = pneg %p457_p13 }
  0x18   : > { %v196_v3 = vld [vmem:[%s193_s5 + $0x8] sm:$0xf]  ;;  %v195_v4 = vld [vmem:[%s193_s5] sm:$0xff]  ;;  %s459_s15 = sshll.u32 %s536_s28, 4  ;;  %s460_s15 = int_to_ptr.vmem [resolvable:$false] %s459_s15 }
  0x19   : > { %390 = vmatpush3.msk.msra.mxu0 %vm207_vm1, %v196_v3  ;;  %s461_s29 = scalar_lea.vmem %s460_s15, 256  ;;  %p462_p1 = scmp.lt.s32.totalorder %s298_s18, %s460_s15 }
  0x1a   : > { %391 = vmatprep.subr.mxu0 %v533_v0  ;;  %p463_p2 = scmp.lt.s32.totalorder %s461_s29, %s455_s27 }
  0x1b   : > { %392 = vmatpush3.msra.mxu0 %v195_v4 }
  0x1c   : > { %394 = vmatmul.mubr.msk.f32.vlgmr.msra.gmra.mxu0 %vm203_vm2, %v194_v5  ;;  %p464_p3 = por %p463_p2, %p462_p1 }
  0x1e   : > { %p465_p5 = pnand %p464_p3, %p458_p0 }
  0x92   : > { %v201_v6 = vpop.permute.xlu0 %200 }
  0xdc   : > { %v277_v7 = vpop.f32.mrf.mxu0 }
  0xdd   : > { %v278_v8 = vadd.f32 %v277_v7, %v201_v6 }
  0xde   : > { %v395_v9 = vpop.f32.mrf.mxu0 }
  0xdf   : > { %281 = vst [vmem:[%s185_s11] sm:$0xff] %v278_v8 }
  0xe0   : > { %468 = shalt.err (!%p465_p5)
}
  0xe1   : > { %s469_s30 = scalar_lea.hbm %s628_s23, 128  ;;  %s473_s6 = scalar_lea.hbm %s671_s3, 256 }
  0xe2   : > { %p470_p6 = scmp.ne.s32.totalorder %s628_s23, %s469_s30  ;;  %p474_p10 = scmp.lt.s32.totalorder %s628_s23, %s671_s3 }
  0xe3   : > { %p475_p11 = scmp.lt.s32.totalorder %s473_s6, %s469_s30 }
  0xe4   : > { %p471_p7 = pnand %p470_p6, %p597_p4 }
  0xe5   : > { %p476_p12 = por %p475_p11, %p474_p10 }
  0xe6   : > { %p472_p9 = pneg %p471_p7 }
  0xe8   : > { %p477_p13 = pnand %p476_p12, %p472_p9 }
  0xea   : > { %480 = shalt.err (!%p477_p13)
}
  0xeb   : > { %396 = dma.vmem_to_hbm [thread:$0]  (%p597_p4), %s298_s18, 128, %s628_s23, %s283_s26  }
  0xec PF: > { %p402_p0 = scmp.ge.s32.totalorder %s531_s17, 2  ;;  %s309_s9 = sand.u32 1, %s511_s12  }
  0xed   : > { %s310_s10 = scalar_lea.sflag [#allocation3], %s309_s9 }
  0xee   : > { %p399_p1 = pnand %p402_p0, %p604_p8 }
  0xf0   : > { %p400_p2 = pneg %p399_p1 }
  0xf2   : > { %506 = dma.done.wait (%p400_p2), %s310_s10, 128  }
  0xf3   : > { %508 = vsyncadd (%p400_p2), %s310_s10, 4294967168  ;;  %s16_s17 = sadd.s32 1, %s531_s17   ;;  %s674_s12 = smov %s515_s13 }
  0xf4   : > { %p13_p3 = scmp.ge.s32.totalorder %s16_s17, 4   ;;  %s675_s13 = smov %s519_s14 }
  0xf5   : > { %s676_s14 = smov %s610_s25  ;;  %s677_s15 = smov %s527_s16 }
  0xf6   : > { %s678_s16 = smov %s680_s20  ;;  %15 = sbr.rel (!%p13_p3) target bundleno = 4 (0x4), region = 67 }
  0xfb   :  { %315 = vsyncpa [#allocation3], 1 }
  0xfc   :  { %317 = vsyncpa [#allocation3 + $0x1], 1 }

</bundles_post_ra>
